<compile_context>
chip_gen: v5e
topology: v5e:2x2
jax: 0.10.0
libtpu: 0.0.40
codegen_flags: <defaults>
</compile_context>

<pallas_src>
import functools

import jax
import jax.numpy as jnp
import numpy as np
from jax.experimental import pallas as pl
from jax.experimental.pallas import tpu as pltpu


def _round_up(x, m):
    return ((x + m - 1) // m) * m


def _vmem_capacity_bytes():
    """Best-effort VMEM capacity query; conservative (v7x-sized) fallback."""
    try:
        if hasattr(pltpu, "get_tpu_info"):
            info = pltpu.get_tpu_info()
            for name in ("vmem_capacity_bytes", "vmem_size_bytes", "vmem_bytes"):
                cap = getattr(info, name, None)
                if cap:
                    return int(cap)
    except Exception:
        pass
    return 64 * 1024 * 1024


def _vmem_footprint_bytes(b, d, itemsize, tm):
    """Rough per-kernel VMEM footprint estimate for tile width tm."""
    b_pad = _round_up(max(b, tm), tm)
    resident = 2 * b_pad * d * itemsize            # full embeddings (double-buffer worst case)
    streamed = 2 * d * tm * itemsize + 2 * tm * 4  # anchor tile (x^T block) + label row tile
    labels = 2 * b_pad * 4                         # resident label column
    outputs = 4 * 2 * tm * 4                       # two (1, TM) f32 outputs, double-buffered
    slabs = 6 * b_pad * tm * 4                     # sim + live mask / exp temporaries (f32)
    return resident + streamed + labels + outputs + slabs + (1 << 20)


def _pick_tiling(b, d, itemsize, block_rows=None):
    cap = _vmem_capacity_bytes()
    budget = max(32 << 20, min(int(cap * 3 // 4), 100 << 20))   # ~96 MiB on 128 MiB VMEM, ~48 MiB on 64 MiB
    if block_rows is not None:
        tm = max(128, _round_up(int(block_rows), 128))
    else:
        tm = 256 if cap >= (96 << 20) else 128      # v5e/v6e: 256; v7x (64 MiB): 128
    tm = min(tm, _round_up(b, 128))                 # don't over-pad tiny batches
    while tm > 128 and _vmem_footprint_bytes(b, d, itemsize, tm) > budget:
        tm -= 128
    # TODO(synk): for very large B on 64 MiB-VMEM parts (v7x), add in-kernel column
    # chunking over the sample axis instead of relying on TM reduction alone.
    limit = max(budget, min(_vmem_footprint_bytes(b, d, itemsize, tm), int(cap * 0.9)))
    return tm, int(limit)


def _ms_loss_kernel(xf_ref, xt_t_ref, lab_col_ref, lab_row_ref,
                    loss_ref, valid_ref, *,
                    pos_weight, neg_weight, margin, thresh, b_real, tm):
    i = pl.program_id(0)
    col0 = i * tm                                   # global anchor offset of this tile

    xf = xf_ref[...]                                # (B_pad, D)  all embeddings (LHS, resident)
    xt = xt_t_ref[...]                              # (D, TM)     this tile's anchors, transposed (RHS)

    # sim[c, r] = <x[c], x[col0 + r]> -- MXU-native contraction (LHS minor vs
    # RHS major), f32 accumulation.  No in-kernel transpose.
    sim = jax.lax.dot_general(
        xf, xt,
        dimension_numbers=(((1,), (0,)), ((), ())),
        preferred_element_type=jnp.float32)         # (B_pad, TM) f32

    bp = xf.shape[0]
    lab_all = lab_col_ref[...]                      # (B_pad, 1) int32: all labels
    lab_anchor = lab_row_ref[...]                   # (1, TM)    int32: this tile's labels

    same = lab_all == lab_anchor                    # (B_pad, TM)

    cid = jax.lax.broadcasted_iota(jnp.int32, (bp, tm), 0)            # sample global id
    agid = jax.lax.broadcasted_iota(jnp.int32, (1, tm), 1) + col0     # anchor global id (1, TM)
    diag = cid == agid                                                # self-pairs
    sample_ok = cid < b_real                                          # mask padded samples
    anchor_ok = agid < b_real                                         # mask padded anchors (1, TM)

    pos_mask = jnp.logical_and(jnp.logical_and(same, jnp.logical_not(diag)), sample_ok)
    neg_mask = jnp.logical_and(jnp.logical_not(same), sample_ok)

    POS_INF = jnp.float32(1e30)
    NEG_INF = jnp.float32(-1e30)

    # per-anchor min positive / max negative similarity (reduce over samples)
    min_pos = jnp.min(jnp.where(pos_mask, sim, POS_INF), axis=0, keepdims=True)  # (1, TM)
    max_neg = jnp.max(jnp.where(neg_mask, sim, NEG_INF), axis=0, keepdims=True)  # (1, TM)

    # Mining with the margin folded into the per-anchor scalars (saves two
    # full-slab VPU adds):  neg kept if sim > min_pos - margin,
    #                       pos kept if sim < max_neg + margin.
    thr_neg = min_pos - jnp.float32(margin)          # (1, TM)
    thr_pos = max_neg + jnp.float32(margin)          # (1, TM)
    mined_neg = jnp.logical_and(neg_mask, sim > thr_neg)
    mined_pos = jnp.logical_and(pos_mask, sim < thr_pos)

    # mined_pos / mined_neg are disjoint -> one fused exp (EUP is single-issue).
    # TODO(synk): for unnormalized embeddings (|sim| >> 1) a max-subtracted
    # log-sum-exp would be needed to keep exp(neg_w * sim) inside f32 range.
    w = jnp.where(mined_pos, jnp.float32(-pos_weight), jnp.float32(neg_weight))
    e = jnp.exp(w * (sim - jnp.float32(thresh)))
    sum_pos = jnp.sum(jnp.where(mined_pos, e, 0.0), axis=0, keepdims=True)  # (1, TM)
    sum_neg = jnp.sum(jnp.where(mined_neg, e, 0.0), axis=0, keepdims=True)  # (1, TM)

    # Validity straight from per-anchor scalars (no extra slab reductions and
    # no exp-underflow failure mode): both mined sets are non-empty exactly
    # when min_pos < max_neg + margin (then the arg-min positive and the
    # arg-max negative are both kept), given at least one pos and one neg exist.
    has_pos = min_pos < jnp.float32(5e29)
    has_neg = max_neg > jnp.float32(-5e29)
    valid = jnp.logical_and(jnp.logical_and(has_pos, has_neg),
                            jnp.logical_and(thr_pos > min_pos, anchor_ok))  # (1, TM)

    pos_term = (1.0 / pos_weight) * jnp.log(1.0 + sum_pos)
    neg_term = (1.0 / neg_weight) * jnp.log(1.0 + sum_neg)

    # Lane-dense (1, TM) stores.
    loss_ref[...] = jnp.where(valid, pos_term + neg_term, 0.0)
    valid_ref[...] = valid.astype(jnp.float32)


def multisimilarity_loss(batch, labels, *,
                         pos_weight=2.0, neg_weight=40.0,
                         margin=0.1, thresh=0.5,
                         matmul_dtype=jnp.bfloat16, block_rows=None):
    """JAX/Pallas equivalent of Criterion.forward(batch, labels)."""
    B, D = batch.shape
    isz = jnp.dtype(matmul_dtype).itemsize

    TM, vmem_limit = _pick_tiling(B, D, isz, block_rows)
    B_pad = _round_up(max(B, TM), TM)
    num_tiles = B_pad // TM

    x = batch.astype(matmul_dtype)
    lab = labels.astype(jnp.int32)
    if B_pad != B:
        x = jnp.pad(x, ((0, B_pad - B), (0, 0)))
        lab = jnp.pad(lab, (0, B_pad - B), constant_values=-1)
    xT = jnp.transpose(x)                    # (D, B_pad): one-time XLA transpose; anchors on lanes
    lab_col = lab.reshape(B_pad, 1)
    lab_row = lab.reshape(1, B_pad)

    kernel = functools.partial(
        _ms_loss_kernel,
        pos_weight=float(pos_weight), neg_weight=float(neg_weight),
        margin=float(margin), thresh=float(thresh),
        b_real=int(B), tm=int(TM),
    )

    cost = pl.CostEstimate(
        flops=int(2 * B_pad * B_pad * D),
        transcendentals=int(B_pad * B_pad),                     # one fused exp per sim entry
        bytes_accessed=int(2 * B_pad * D * isz + 2 * B_pad * 4
                           + 2 * num_tiles * TM * 4),
    )

    loss_mat, valid_mat = pl.pallas_call(
        kernel,
        out_shape=(jax.ShapeDtypeStruct((num_tiles, TM), jnp.float32),
                   jax.ShapeDtypeStruct((num_tiles, TM), jnp.float32)),
        grid=(num_tiles,),
        in_specs=[
            pl.BlockSpec((B_pad, D), lambda i: (0, 0)),     # full embeddings (LHS, resident)
            pl.BlockSpec((D, TM), lambda i: (0, i)),        # anchor tile, transposed (RHS, streamed)
            pl.BlockSpec((B_pad, 1), lambda i: (0, 0)),     # all labels, column (resident)
            pl.BlockSpec((1, TM), lambda i: (0, i)),        # this tile's labels, row
        ],
        out_specs=(pl.BlockSpec((1, TM), lambda i: (i, 0)),
                   pl.BlockSpec((1, TM), lambda i: (i, 0))),
        compiler_params=pltpu.CompilerParams(
            dimension_semantics=("parallel",),              # row tiles are independent
            vmem_limit_bytes=int(vmem_limit),
        ),
        cost_estimate=cost,
    )(x, xT, lab_col, lab_row)

    total = jnp.sum(loss_mat)
    count = jnp.sum(valid_mat)
    # Guarded mean over anchors that contributed a loss term (0 if none).
    return jnp.where(count > 0.0, total / jnp.maximum(count, 1.0), jnp.float32(0.0))


def _reference_numpy(batch, labels, pos_weight, neg_weight, margin, thresh):
    """Pure NumPy port of the PyTorch forward for verification."""
    batch = np.asarray(batch, dtype=np.float64)
    labels = np.asarray(labels)
    sim = batch @ batch.T
    losses = []
    for i in range(len(batch)):
        pos_idxs = labels == labels[i]
        pos_idxs[i] = False
        neg_idxs = labels != labels[i]
        a_pos = sim[i][pos_idxs]
        a_neg = sim[i][neg_idxs]
        keep_neg = a_neg + margin > np.min(a_pos)
        keep_pos = a_pos - margin < np.max(a_neg)
        if not np.sum(keep_neg) or not np.sum(keep_pos):
            continue
        a_neg = a_neg[keep_neg]
        a_pos = a_pos[keep_pos]
        pos_term = 1.0 / pos_weight * np.log(1 + np.sum(np.exp(-pos_weight * (a_pos - thresh))))
        neg_term = 1.0 / neg_weight * np.log(1 + np.sum(np.exp(neg_weight * (a_neg - thresh))))
        losses.append(pos_term + neg_term)
    if not losses:
        return 0.0
    return float(np.mean(losses))


if __name__ == "__main__":
    # Standard MultiSimilarity defaults ("opt" hyper-parameters).
    POS_W, NEG_W, MARGIN, THRESH = 2.0, 40.0, 0.1, 0.5

    B, D = 8, 32  # batch of 8 embeddings, dim 32
    key = jax.random.PRNGKey(0)
    kx, _ = jax.random.split(key)
    x = jax.random.normal(kx, (B, D), dtype=jnp.float32)
    x = x / jnp.linalg.norm(x, axis=1, keepdims=True)        # L2-normalized embeddings
    labels = jnp.array([0, 0, 1, 1, 2, 2, 3, 3], dtype=jnp.int32)
    labels_np = np.array(labels)

    # 1) Default fast path: bf16 MXU inputs, f32 accumulation.  Validate
    #    against a reference computed on bf16-rounded inputs (accepted semantic
    #    difference: marginal mining decisions follow the bf16-rounded sims).
    loss_bf16 = jax.block_until_ready(
        multisimilarity_loss(x, labels,
                             pos_weight=POS_W, neg_weight=NEG_W,
                             margin=MARGIN, thresh=THRESH))
    x_bf16_np = np.array(x.astype(jnp.bfloat16).astype(jnp.float32))
    ref_bf16 = _reference_numpy(x_bf16_np, labels_np, POS_W, NEG_W, MARGIN, THRESH)
    assert np.isfinite(float(loss_bf16))
    assert abs(float(loss_bf16) - ref_bf16) < 2e-3 * max(1.0, abs(ref_bf16)), \
        (float(loss_bf16), ref_bf16)

    # 2) f32 path: check against the float64 reference.
    loss_f32 = jax.block_until_ready(
        multisimilarity_loss(x, labels,
                             pos_weight=POS_W, neg_weight=NEG_W,
                             margin=MARGIN, thresh=THRESH,
                             matmul_dtype=jnp.float32))
    ref_f32 = _reference_numpy(np.array(x), labels_np, POS_W, NEG_W, MARGIN, THRESH)
    assert abs(float(loss_f32) - ref_f32) < 1e-4 * max(1.0, abs(ref_f32)), \
        (float(loss_f32), ref_f32)

    print("KERNEL_OK")
</pallas_src>

<mosaic_0001>
module attributes {stable_mosaic.version = 11 : i64} {
  func.func @_ms_loss_kernel(%arg0: i32, %arg1: memref<128x32xbf16, #tpu.memory_space<vmem>>, %arg2: memref<32x128xbf16, #tpu.memory_space<vmem>>, %arg3: memref<128x1xi32, #tpu.memory_space<vmem>>, %arg4: memref<1x128xi32, #tpu.memory_space<vmem>>, %arg5: memref<1x128xf32, #tpu.memory_space<vmem>>, %arg6: memref<1x128xf32, #tpu.memory_space<vmem>>) attributes {dimension_semantics = [#tpu.dimension_semantics<parallel>], iteration_bounds = array<i64: 1>, scalar_prefetch = 0 : i64, scratch_operands = 0 : i64, tpu.core_type = #tpu.core_type<tc>, window_params = [{pipeline_mode = #tpu.pipeline_mode<synchronous>, transform_indices = @transform_0, window_bounds = array<i64: 128, 32>}, {transform_indices = @transform_1, window_bounds = array<i64: 32, 128>}, {pipeline_mode = #tpu.pipeline_mode<synchronous>, transform_indices = @transform_2, window_bounds = array<i64: 128, 1>}, {transform_indices = @transform_3, window_bounds = array<i64: 1, 128>}, {transform_indices = @transform_4, window_bounds = array<i64: 1, 128>}, {transform_indices = @transform_5, window_bounds = array<i64: 1, 128>}]} {
    %c128_i32 = arith.constant 128 : i32
    %0 = arith.muli %arg0, %c128_i32 : i32
    %c0 = arith.constant 0 : index
    %c0_0 = arith.constant 0 : index
    %1 = vector.load %arg1[%c0, %c0_0] : memref<128x32xbf16, #tpu.memory_space<vmem>>, vector<128x32xbf16>
    %c0_1 = arith.constant 0 : index
    %c0_2 = arith.constant 0 : index
    %2 = vector.load %arg2[%c0_1, %c0_2] : memref<32x128xbf16, #tpu.memory_space<vmem>>, vector<32x128xbf16>
    %cst = arith.constant dense<0.000000e+00> : vector<128x128xf32>
    %3 = tpu.matmul %1, %2, %cst {dimension_numbers = #tpu.dot_dimension_numbers<[1], [0], [0], [1], [0, 0, 1, 1], [], []>} : vector<128x32xbf16>, vector<32x128xbf16>, vector<128x128xf32> -> vector<128x128xf32>
    %c0_3 = arith.constant 0 : index
    %c0_4 = arith.constant 0 : index
    %4 = vector.load %arg3[%c0_3, %c0_4] : memref<128x1xi32, #tpu.memory_space<vmem>>, vector<128x1xi32>
    %c0_5 = arith.constant 0 : index
    %c0_6 = arith.constant 0 : index
    %5 = vector.load %arg4[%c0_5, %c0_6] : memref<1x128xi32, #tpu.memory_space<vmem>>, vector<1x128xi32>
    %6 = vector.broadcast %4 : vector<128x1xi32> to vector<128x128xi32>
    %7 = vector.broadcast %5 : vector<1x128xi32> to vector<128x128xi32>
    %8 = arith.cmpi eq, %6, %7 : vector<128x128xi32>
    %9 = tpu.iota {dimensions = array<i32: 0>} : vector<128x128xi32>
    %10 = tpu.iota {dimensions = array<i32: 1>} : vector<1x128xi32>
    %11 = vector.broadcast %0 : i32 to vector<1x128xi32>
    %12 = arith.addi %10, %11 : vector<1x128xi32>
    %13 = vector.broadcast %12 : vector<1x128xi32> to vector<128x128xi32>
    %14 = arith.cmpi eq, %9, %13 : vector<128x128xi32>
    %c8_i32 = arith.constant 8 : i32
    %15 = vector.broadcast %c8_i32 : i32 to vector<128x128xi32>
    %16 = arith.cmpi slt, %9, %15 : vector<128x128xi32>
    %c8_i32_7 = arith.constant 8 : i32
    %17 = vector.broadcast %c8_i32_7 : i32 to vector<1x128xi32>
    %18 = arith.cmpi slt, %12, %17 : vector<1x128xi32>
    %cst_8 = arith.constant dense<true> : vector<128x128xi1>
    %19 = arith.xori %14, %cst_8 : vector<128x128xi1>
    %20 = arith.andi %8, %19 : vector<128x128xi1>
    %21 = arith.andi %20, %16 : vector<128x128xi1>
    %cst_9 = arith.constant dense<true> : vector<128x128xi1>
    %22 = arith.xori %8, %cst_9 : vector<128x128xi1>
    %23 = arith.andi %22, %16 : vector<128x128xi1>
    %cst_10 = arith.constant 1.000000e+30 : f32
    %24 = vector.broadcast %cst_10 : f32 to vector<128x128xf32>
    %25 = arith.select %21, %3, %24 : vector<128x128xi1>, vector<128x128xf32>
    %cst_11 = arith.constant dense<0x7F800000> : vector<128xf32>
    %26 = vector.multi_reduction <minimumf>, %25, %cst_11 [0] : vector<128x128xf32> to vector<128xf32>
    %27 = vector.shape_cast %26 : vector<128xf32> to vector<1x128xf32>
    %cst_12 = arith.constant -1.000000e+30 : f32
    %28 = vector.broadcast %cst_12 : f32 to vector<128x128xf32>
    %29 = arith.select %23, %3, %28 : vector<128x128xi1>, vector<128x128xf32>
    %cst_13 = arith.constant dense<0xFF800000> : vector<128xf32>
    %30 = vector.multi_reduction <maximumf>, %29, %cst_13 [0] : vector<128x128xf32> to vector<128xf32>
    %31 = vector.shape_cast %30 : vector<128xf32> to vector<1x128xf32>
    %cst_14 = arith.constant 1.000000e-01 : f32
    %32 = vector.broadcast %cst_14 : f32 to vector<1x128xf32>
    %33 = arith.subf %27, %32 : vector<1x128xf32>
    %cst_15 = arith.constant 1.000000e-01 : f32
    %34 = vector.broadcast %cst_15 : f32 to vector<1x128xf32>
    %35 = arith.addf %31, %34 : vector<1x128xf32>
    %36 = vector.broadcast %33 : vector<1x128xf32> to vector<128x128xf32>
    %37 = arith.cmpf ogt, %3, %36 : vector<128x128xf32>
    %38 = arith.andi %23, %37 : vector<128x128xi1>
    %39 = vector.broadcast %35 : vector<1x128xf32> to vector<128x128xf32>
    %40 = arith.cmpf olt, %3, %39 : vector<128x128xf32>
    %41 = arith.andi %21, %40 : vector<128x128xi1>
    %cst_16 = arith.constant -2.000000e+00 : f32
    %cst_17 = arith.constant 4.000000e+01 : f32
    %42 = vector.broadcast %cst_16 : f32 to vector<128x128xf32>
    %43 = vector.broadcast %cst_17 : f32 to vector<128x128xf32>
    %44 = arith.select %41, %42, %43 : vector<128x128xi1>, vector<128x128xf32>
    %cst_18 = arith.constant 5.000000e-01 : f32
    %45 = vector.broadcast %cst_18 : f32 to vector<128x128xf32>
    %46 = arith.subf %3, %45 : vector<128x128xf32>
    %47 = arith.mulf %44, %46 : vector<128x128xf32>
    %48 = math.exp %47 : vector<128x128xf32>
    %cst_19 = arith.constant 0.000000e+00 : f32
    %49 = vector.broadcast %cst_19 : f32 to vector<128x128xf32>
    %50 = arith.select %41, %48, %49 : vector<128x128xi1>, vector<128x128xf32>
    %cst_20 = arith.constant dense<0.000000e+00> : vector<128xf32>
    %51 = vector.multi_reduction <add>, %50, %cst_20 [0] : vector<128x128xf32> to vector<128xf32>
    %52 = vector.shape_cast %51 : vector<128xf32> to vector<1x128xf32>
    %cst_21 = arith.constant 0.000000e+00 : f32
    %53 = vector.broadcast %cst_21 : f32 to vector<128x128xf32>
    %54 = arith.select %38, %48, %53 : vector<128x128xi1>, vector<128x128xf32>
    %cst_22 = arith.constant dense<0.000000e+00> : vector<128xf32>
    %55 = vector.multi_reduction <add>, %54, %cst_22 [0] : vector<128x128xf32> to vector<128xf32>
    %56 = vector.shape_cast %55 : vector<128xf32> to vector<1x128xf32>
    %cst_23 = arith.constant 5.000000e+29 : f32
    %57 = vector.broadcast %cst_23 : f32 to vector<1x128xf32>
    %58 = arith.cmpf olt, %27, %57 : vector<1x128xf32>
    %cst_24 = arith.constant -5.000000e+29 : f32
    %59 = vector.broadcast %cst_24 : f32 to vector<1x128xf32>
    %60 = arith.cmpf ogt, %31, %59 : vector<1x128xf32>
    %61 = arith.andi %58, %60 : vector<1x128xi1>
    %62 = arith.cmpf ogt, %35, %27 : vector<1x128xf32>
    %63 = arith.andi %62, %18 : vector<1x128xi1>
    %64 = arith.andi %61, %63 : vector<1x128xi1>
    %cst_25 = arith.constant 1.000000e+00 : f32
    %65 = vector.broadcast %cst_25 : f32 to vector<1x128xf32>
    %66 = arith.addf %65, %52 : vector<1x128xf32>
    %67 = math.log %66 : vector<1x128xf32>
    %cst_26 = arith.constant 5.000000e-01 : f32
    %68 = vector.broadcast %cst_26 : f32 to vector<1x128xf32>
    %69 = arith.mulf %68, %67 : vector<1x128xf32>
    %cst_27 = arith.constant 1.000000e+00 : f32
    %70 = vector.broadcast %cst_27 : f32 to vector<1x128xf32>
    %71 = arith.addf %70, %56 : vector<1x128xf32>
    %72 = math.log %71 : vector<1x128xf32>
    %cst_28 = arith.constant 2.500000e-02 : f32
    %73 = vector.broadcast %cst_28 : f32 to vector<1x128xf32>
    %74 = arith.mulf %73, %72 : vector<1x128xf32>
    %75 = arith.addf %69, %74 : vector<1x128xf32>
    %cst_29 = arith.constant 0.000000e+00 : f32
    %76 = vector.broadcast %cst_29 : f32 to vector<1x128xf32>
    %77 = arith.select %64, %75, %76 : vector<1x128xi1>, vector<1x128xf32>
    %c0_30 = arith.constant 0 : index
    %c0_31 = arith.constant 0 : index
    %78 = vector.load %arg5[%c0_30, %c0_31] : memref<1x128xf32, #tpu.memory_space<vmem>>, vector<1x128xf32>
    tpu.vector_store %arg5[%c0_30, %c0_31], %77 {strides = array<i32>} : memref<1x128xf32, #tpu.memory_space<vmem>>, vector<1x128xf32>,
    %79 = arith.extui %64 : vector<1x128xi1> to vector<1x128xi32>
    %80 = arith.sitofp %79 : vector<1x128xi32> to vector<1x128xf32>
    %c0_32 = arith.constant 0 : index
    %c0_33 = arith.constant 0 : index
    %81 = vector.load %arg6[%c0_32, %c0_33] : memref<1x128xf32, #tpu.memory_space<vmem>>, vector<1x128xf32>
    tpu.vector_store %arg6[%c0_32, %c0_33], %80 {strides = array<i32>} : memref<1x128xf32, #tpu.memory_space<vmem>>, vector<1x128xf32>,
    return
  }
  func.func @transform_0(%arg0: i32) -> (i32, i32) {
    %c0_i32 = arith.constant 0 : i32
    %c0_i32_0 = arith.constant 0 : i32
    %c0_i32_1 = arith.constant 0 : i32
    return %c0_i32, %c0_i32_0 : i32, i32
  }
  func.func @transform_1(%arg0: i32) -> (i32, i32) {
    %c0_i32 = arith.constant 0 : i32
    %c0_i32_0 = arith.constant 0 : i32
    return %c0_i32, %arg0 : i32, i32
  }
  func.func @transform_2(%arg0: i32) -> (i32, i32) {
    %c0_i32 = arith.constant 0 : i32
    %c0_i32_0 = arith.constant 0 : i32
    %c0_i32_1 = arith.constant 0 : i32
    return %c0_i32, %c0_i32_0 : i32, i32
  }
  func.func @transform_3(%arg0: i32) -> (i32, i32) {
    %c0_i32 = arith.constant 0 : i32
    %c0_i32_0 = arith.constant 0 : i32
    return %c0_i32, %arg0 : i32, i32
  }
  func.func @transform_4(%arg0: i32) -> (i32, i32) {
    %c0_i32 = arith.constant 0 : i32
    %c0_i32_0 = arith.constant 0 : i32
    return %arg0, %c0_i32 : i32, i32
  }
  func.func @transform_5(%arg0: i32) -> (i32, i32) {
    %c0_i32 = arith.constant 0 : i32
    %c0_i32_0 = arith.constant 0 : i32
    return %arg0, %c0_i32 : i32, i32
  }
}

</mosaic_0001>

<bundles_post_ra>
// kernel: tpu_custom_call.1
= control target key start
LH: loop header
LB: loop body
LE: loop exit
PB: predicated region body
PF: predicated region fallthrough
CT: control target
= control target key end

     0   :  { %11 = vsyncpa [#allocation3], 0  ;;  %v879_v1 = vmov 0   ;;  %s1018_s0 = inlined_call_operand.vmem [shape: bf16[128,32], index: 0, kind: input, shape index: {}]   ;;  %s1019_s1 = inlined_call_operand.vmem [shape: bf16[32,128], index: 1, kind: input, shape index: {}]   ;;  %s1020_s2 = inlined_call_operand.vmem [shape: s32[128,1], index: 2, kind: input, shape index: {}]   ;;  %s1021_s3 = inlined_call_operand.vmem [shape: s32[1,128], index: 3, kind: input, shape index: {}]   ;;  %s1022_s4 = inlined_call_operand.hbm [shape: f32[1,128], index: 4, kind: output, shape index: {0}]   ;;  %s1023_s5 = inlined_call_operand.hbm [shape: f32[1,128], index: 5, kind: output, shape index: {1}]  }
   0x1   :  { %v806_v0 = vld [vmem:[%s1019_s1 + $0x8] sm:$0xff]  ;;  %819 = vset.pattern.permute.xlu0 %v879_v1  ;;  %v169_v2 = vld [vmem:[%s1020_s2] sm:$0xff] }
   0x2   :  { %126 = vmatpush.bf16.msra.mxu0 %v806_v0  ;;  %v805_v3 = vld [vmem:[%s1019_s1] sm:$0xff]  ;;  %187 = vperm.xlu0 %819, %v169_v2  }
   0x3   :  { %808 = vmatpush.bf16.msra.mxu2 %v806_v0  ;;  %809 = vmatpush.bf16.msra.mxu3 %v806_v0 }
   0x4   :  { %807 = vmatpush.bf16.msra.mxu1 %v806_v0 }
   0x5   :  { %12 = vsyncpa [#allocation5], 0  ;;  %v797_v4 = vld [vmem:[%s1018_s0] sm:$0xff]  ;;  %vm95_vm0 = vcmask 261120   ;;  %v803_v6 = vld [vmem:[%s1018_s0 + $0x30] sm:$0xff]  ;;  %v251_v12 = vlaneseq  ;;  %vm880_vm2 = vmmov 1  }
   0x6   :  { %127 = vmatpush.bf16.msra.mxu0 %v805_v3  ;;  %v801_v5 = vld [vmem:[%s1018_s0 + $0x20] sm:$0xff]  ;;  %v799_v7 = vld [vmem:[%s1018_s0 + $0x10] sm:$0xff]  ;;  %v798_v8 = vld [vmem:[%s1018_s0 + $0x8] sm:$0xff]  ;;  %s717_s17 = sshll.u32 %s1023_s5, 4  ;;  %v882_v61 = vmov 40.0   ;;  %s884_s5 = smov [#allocation2]   ;;  %s718_s17 = int_to_ptr.hbm [resolvable:$true] %s717_s17 }
   0x7   :  { %811 = vmatpush.bf16.msra.mxu2 %v805_v3  ;;  %812 = vmatpush.bf16.msra.mxu3 %v805_v3  ;;  %v802_v9 = vld [vmem:[%s1018_s0 + $0x28] sm:$0xff]  ;;  %v804_v10 = vld [vmem:[%s1018_s0 + $0x38] sm:$0xff]  ;;  %v252_v13 = vshrl.u32 %v251_v12, 7  ;;  %v269_v14 = vand.u32 127, %v251_v12  ;;  %v820_v15 = vld [vmem:[%s1021_s3] ss:$0 sm:$0xff] }
   0x8   :  { %810 = vmatpush.bf16.msra.mxu1 %v805_v3  ;;  %v800_v11 = vld [vmem:[%s1018_s0 + $0x18] sm:$0xff]  ;;  %s881_s0 = smov [#allocation4]   ;;  %v883_v3 = vmov 0.0   ;;  %s704_s18 = sshll.u32 %s884_s5, 4  ;;  %s705_s18 = int_to_ptr.vmem [resolvable:$true] %s704_s18 }
   0x9   :  { %771 = vmatmul.msk.bf16.vlgmr.msra.gmra.mxu0 %vm95_vm0, %v797_v4  ;;  %vm272_vm1 = vcmp.eq.s32.totalorder %v252_v13, %v269_v14  ;;  %vm304_vm9 = vcmp.lt.s32.totalorder %v269_v14, 8  ;;  %s715_s3 = sshll.u32 %s881_s0, 4  ;;  %s706_s21 = sshll.u32 %s1022_s4, 4  ;;  %s716_s3 = int_to_ptr.vmem [resolvable:$true] %s715_s3  ;;  %s707_s21 = int_to_ptr.hbm [resolvable:$true] %s706_s21 }
   0xa   :  { %775 = vmatmul.msk.bf16.vlgmr.msra.gmra.mxu2 %vm95_vm0, %v801_v5  ;;  %777 = vmatmul.msk.bf16.vlgmr.msra.gmra.mxu3 %vm95_vm0, %v803_v6  ;;  %vm305_vm3 = vmxor %vm272_vm1, %vm880_vm2 }
   0xb   :  { %773 = vmatmul.msk.bf16.vlgmr.msra.gmra.mxu1 %vm95_vm0, %v799_v7 }
  0x19   :  { %772 = vmatmul.msk.bf16.gmra.mxu0 %vm95_vm0, %v798_v8 }
  0x1a   :  { %776 = vmatmul.msk.bf16.gmra.mxu2 %vm95_vm0, %v802_v9  ;;  %778 = vmatmul.msk.bf16.gmra.mxu3 %vm95_vm0, %v804_v10 }
  0x1b   :  { %774 = vmatmul.msk.bf16.gmra.mxu1 %vm95_vm0, %v800_v11 }
  0x74   :  { %v188_v16 = vpop.permute.xlu0 %187 }
  0x75   :  { %vm235_vm4 = vcmp.eq.s32.totalorder %v188_v16, %v820_v15 }
  0x76   :  { %vm959_vm5 = vmand %vm235_vm4, %vm305_vm3 }
  0x77   :  { %vm963_vm6 = vmxor %vm235_vm4, %vm880_vm2 }
  0x86   :  { %v967_v19 = vpop.f32.mrf.mxu0 }
  0x87   :  { %v385_v20 = vsel %vm959_vm5, %v967_v19, 1e+30  ;;  %v422_v21 = vsel %vm963_vm6, %v967_v19, -1e+30  ;;  %v780_v59 = vadd.f32 -0.5, %v967_v19 }
  0x88   :  { %v401_v22 = vmin.f32 %v385_v20, 1e+30  ;;  %v438_v23 = vmax.f32 %v422_v21, -1e+30  ;;  %v139_v24 = vpop.f32.mrf.mxu1 }
  0x8a   :  { %v405_v25 = vmin.f32 %v401_v22, 1e+30  ;;  %v442_v26 = vmax.f32 %v438_v23, -1e+30 }
  0x8c   :  { %v409_v27 = vmin.f32 %v405_v25, 1e+30  ;;  %v446_v28 = vmax.f32 %v442_v26, -1e+30 }
  0x8d   :  { %v149_v29 = vpop.f32.mrf.mxu2  ;;  %v159_v30 = vpop.f32.mrf.mxu3 }
  0x8e   :  { %v413_v31 = vmin.f32 %v409_v27, 1e+30  ;;  %v450_v32 = vmax.f32 %v446_v28, -1e+30  ;;  %v131_v33 = vpop.f32.mrf.mxu0 }
  0x90   :  { %v415_v34 = vmin.f32 %v413_v31, 1e+30  ;;  %v452_v35 = vmax.f32 %v450_v32, -1e+30  ;;  %v141_v36 = vpop.f32.mrf.mxu1 }
  0x92   :  { %v416_v37 = vrot.slane %v415_v34, 4  ;;  %v453_v38 = vrot.slane %v452_v35, 4 }
  0x94   :  { %v417_v39 = vmin.f32 %v415_v34, %v416_v37  ;;  %v454_v40 = vmax.f32 %v452_v35, %v453_v38 }
  0x95   :  { %v151_v41 = vpop.f32.mrf.mxu2  ;;  %v161_v42 = vpop.f32.mrf.mxu3 }
  0x96   :  { %v418_v43 = vrot.slane %v417_v39, 2  ;;  %v134_v44 = vpop.f32.mrf.mxu0  ;;  %v455_v45 = vrot.slane %v454_v40, 2 }
  0x98   :  { %v419_v46 = vmin.f32 %v417_v39, %v418_v43  ;;  %v144_v47 = vpop.f32.mrf.mxu1  ;;  %v456_v48 = vmax.f32 %v454_v40, %v455_v45 }
  0x9a   :  { %v420_v49 = vrot.slane %v419_v46, 1  ;;  %v457_v50 = vrot.slane %v456_v48, 1 }
  0x9c   :  { %v421_v51 = vmin.f32 %v419_v46, %v420_v49  ;;  %v458_v52 = vmax.f32 %v456_v48, %v457_v50 }
  0x9d   :  { %v154_v53 = vpop.f32.mrf.mxu2  ;;  %v164_v54 = vpop.f32.mrf.mxu3 }
  0x9e   :  { %v136_v55 = vpop.f32.mrf.mxu0  ;;  %v460_v56 = vadd.f32 0.1, %v458_v52  ;;  %vm679_vm7 = vcmp.lt.f32.partialorder %v421_v51, 5e+29  ;;  %vm680_vm8 = vcmp.gt.f32.partialorder %v458_v52, -5e+29 }
  0x9f   :  { %vm976_vm12 = vmand %vm679_vm7, %vm680_vm8  ;;  %v779_v6 = vadd.f32 -0.1, %v421_v51 }
  0xa0   :  { %v146_v57 = vpop.f32.mrf.mxu1  ;;  %vm493_vm10 = vcmp.lt.f32.partialorder %v967_v19, %v460_v56  ;;  %vm682_vm11 = vcmp.gt.f32.partialorder %v460_v56, %v421_v51 }
  0xa1   :  { %vm986_vm13 = vmand %vm959_vm5, %vm493_vm10  ;;  %vm461_vm0 = vcmp.gt.f32.partialorder %v967_v19, %v779_v6 }
  0xa2   :  { %v525_v62 = vsel %vm986_vm13, -2.0, %v882_v61  ;;  %vm992_vm14 = vmand %vm682_vm11, %vm304_vm9 }
  0xa3   :  { %v557_v0 = vmul.f32 %v780_v59, %v525_v62  ;;  %vm684_vm15 = vmand %vm976_vm12, %vm992_vm14 }
  0xa4   :  { %v796_v4 = vsel %vm684_vm15, 1.0, %v883_v3  ;;  %vm477_vm1 = vmand %vm963_vm6, %vm461_vm0 }
  0xa5   :  { %v156_v1 = vpop.f32.mrf.mxu2  ;;  %v166_v2 = vpop.f32.mrf.mxu3  ;;  %v573_v5 = vmul.f32 1.442695, %v557_v0  ;;  %698 = vst [vmem:[#allocation4] sm:$0x1] %v796_v4 }
  0xa6   :  { %720 = dma.vmem_to_hbm [thread:$0]  %s716_s3, 16, %s718_s17, [#allocation5]  }
  0xa7   :  { %821 = vpow2.f32 %v573_v5 }
  0xad   :  { %v822_v7 = vpop.eup %821 }
  0xae   :  { %v605_v8 = vsel %vm986_vm13, %v822_v7, 0.0  ;;  %v642_v9 = vsel %vm477_vm1, %v822_v7, 0.0 }
  0xaf   :  { %v636_v10 = vrot.slane %v605_v8, 4  ;;  %v673_v11 = vrot.slane %v642_v9, 4 }
  0xb1   :  { %v637_v12 = vadd.f32 %v636_v10, %v605_v8  ;;  %v674_v13 = vadd.f32 %v673_v11, %v642_v9 }
  0xb3   :  { %v638_v14 = vrot.slane %v637_v12, 2  ;;  %v675_v15 = vrot.slane %v674_v13, 2 }
  0xb5   :  { %v639_v16 = vadd.f32 %v638_v14, %v637_v12  ;;  %v676_v17 = vadd.f32 %v675_v15, %v674_v13 }
  0xb7   :  { %v640_v20 = vrot.slane %v639_v16, 1  ;;  %v677_v21 = vrot.slane %v676_v17, 1 }
  0xb9   :  { %v641_v22 = vadd.f32 %v640_v20, %v639_v16  ;;  %v678_v19 = vadd.f32 %v677_v21, %v676_v17 }
  0xbb   :  { %v685_v23 = vadd.f32 1.0, %v641_v22  ;;  %v689_v24 = vadd.f32 1.0, %v678_v19 }
  0xbd   :  { %823 = vlog2.f32 %v685_v23 }
  0xbe   :  { %825 = vlog2.f32 %v689_v24 }
  0xc3   :  { %v824_v18 = vpop.eup %823 }
  0xc4   :  { %v826_v25 = vpop.eup %825  ;;  %v687_v26 = vmul.f32 0.6931472, %v824_v18 }
  0xc5   :  { %v691_v27 = vmul.f32 0.6931472, %v826_v25 }
  0xc6   :  { %v688_v28 = vmul.f32 0.5, %v687_v26 }
  0xc7   :  { %v692_v29 = vmul.f32 0.025, %v691_v27 }
  0xc9   :  { %v693_v30 = vadd.f32 %v692_v29, %v688_v28 }
  0xcb   :  { %v694_v31 = vsel %vm684_vm15, %v693_v30, 0.0 }
  0xcc   :  { %695 = vst [vmem:[#allocation2] sm:$0x1] %v694_v31 }
  0xcd   :  { %709 = dma.vmem_to_hbm [thread:$0]  %s705_s18, 16, %s707_s21, [#allocation3]  }
  0xce   :  { %875 = dma.done.wait [#allocation3], 16  }
  0xcf   :  { %876 = vsyncadd [#allocation3], 4294967280 }
  0xd0   :  { %877 = dma.done.wait [#allocation5], 16  }
  0xd1   :  { %878 = vsyncadd [#allocation5], 4294967280 }
  0xd2   :  { %729 = vsyncpa [#allocation3], 1 }
  0xd3   :  { %730 = vsyncpa [#allocation5], 1 }

</bundles_post_ra>
